<compile_context>
chip_gen: v5e
topology: v5e:2x2
jax: 0.10.0
libtpu: 0.0.40
codegen_flags: <defaults>
</compile_context>

<pallas_src>
import jax
import jax.numpy as jnp
from jax.experimental import pallas as pl
from jax.experimental.pallas import tpu as pltpu


def _normalize_kernel(x_ref, mean_ref, inv_std_ref, o_ref):
    # x_ref:       (TB, TF) VMEM tile, native input dtype (cast here, in-kernel)
    # mean_ref:    (1,  TF) f32, broadcast over the batch (sublane) dim
    # inv_std_ref: (1,  TF) f32, std==0 -> 1.0 fixup already folded in
    x = x_ref[...].astype(jnp.float32)
    o_ref[...] = ((x - mean_ref[...]) * inv_std_ref[...]).astype(o_ref.dtype)


def _vmem_capacity_bytes():
    """Physical VMEM capacity; conservative 64 MiB fallback (correct for v7x)."""
    try:
        info = pltpu.get_tpu_info()
        cap = getattr(info, "vmem_capacity_bytes", None)
        if cap:
            return int(cap)
    except Exception:
        pass
    return 64 * 1024 * 1024


def _choose_tiles(B, F, in_bytes, out_bytes, vmem_cap):
    """Pick (tb, tf) so the double-buffered in+out tile footprint ~ VMEM/3."""
    budget = vmem_cap // 3
    row_bytes = F * (in_bytes + out_bytes)

    def _batch_tile(limit_rows):
        if B <= 8:
            return B                         # full batch dim (always legal)
        tb = min(limit_rows, B)
        return max(8, (tb // 8) * 8)         # multiple of 8, never > B

    # Preferred: full feature rows -> fully contiguous DMAs, mean/inv_std stay
    # a single resident (1, F) block.  Split F only when 8 full rows overflow.
    if 2 * 8 * row_bytes <= budget:
        return _batch_tile(budget // (2 * row_bytes)), F

    tf = budget // (2 * 8 * (in_bytes + out_bytes))
    tf = max(128, (tf // 128) * 128)                  # lane-aligned
    tf = min(tf, max(128, (F // 128) * 128))          # never larger than F
    return _batch_tile(8), tf


def base_module_forward(x, mean, std, *, normalize=True, out_dtype=jnp.float32,
                        tile_override=None):
    """Pallas equivalent of BaseModule.forward's normalization step.

    x:    [B, F] array (any float/int dtype; cast to f32 inside the kernel)
    mean: [F]
    std:  [F]   (entries equal to 0 are treated as 1, matching
                 BaseModule.set_normalization_params)
    Returns `out_dtype` (default float32, matching the PyTorch .float() result;
    bf16 is an opt-in traffic optimization for bf16 consumers).
    """
    # TODO(synk): BaseModule.forward is abstract (it returns NotImplementedError
    # after normalization); only the normalization compute is implemented here.
    # The RELU activation from activation_factory is never applied in forward().
    if not normalize:
        return x.astype(out_dtype)

    B, F = x.shape

    # O(F) preprocessing in plain JAX (negligible vs the O(B*F) kernel):
    # std==0 -> 1.0 fixup + exact f32 reciprocal so the kernel multiplies.
    std_f = std.astype(jnp.float32)
    safe_std = jnp.where(std_f == 0.0, jnp.float32(1.0), std_f)
    inv_std = (jnp.float32(1.0) / safe_std).reshape(1, F)
    mean_f = mean.astype(jnp.float32).reshape(1, F)

    vmem_cap = _vmem_capacity_bytes()
    in_bytes = jnp.dtype(x.dtype).itemsize
    out_bytes = jnp.dtype(out_dtype).itemsize
    if tile_override is not None:
        tb, tf = tile_override
    else:
        tb, tf = _choose_tiles(B, F, in_bytes, out_bytes, vmem_cap)

    nb = pl.cdiv(B, tb)
    nf = pl.cdiv(F, tf)

    # Only the O(F) vectors are padded, and only when the feature dim is split
    # (nf > 1).  x and out are never padded or sliced; Pallas masks the ragged
    # boundary blocks (OOB input reads are harmless for this elementwise op).
    if nf * tf != F:
        pad = nf * tf - F
        mean_f = jnp.pad(mean_f, ((0, 0), (0, pad)))
        inv_std = jnp.pad(inv_std, ((0, 0), (0, pad)), constant_values=1.0)

    # Scoped VMEM limit: enough for the double-buffered tiles plus headroom,
    # but never more than 3/4 of physical VMEM (safe on v5e/v6e/v7x).
    footprint = 2 * (tb * tf * (in_bytes + out_bytes) + 2 * tf * 4)
    vmem_limit = int(min(3 * vmem_cap // 4,
                         max(footprint + (4 << 20), 32 << 20)))

    out = pl.pallas_call(
        _normalize_kernel,
        out_shape=jax.ShapeDtypeStruct((B, F), out_dtype),
        # Feature outer, batch INNER: mean/inv_std block index (0, j) is
        # constant across the inner loop -> fetched once per feature block.
        grid=(nf, nb),
        in_specs=[
            pl.BlockSpec((tb, tf), lambda j, i: (i, j)),   # x (native dtype)
            pl.BlockSpec((1, tf), lambda j, i: (0, j)),    # mean
            pl.BlockSpec((1, tf), lambda j, i: (0, j)),    # 1/std (fixed up)
        ],
        out_specs=pl.BlockSpec((tb, tf), lambda j, i: (i, j)),
        compiler_params=pltpu.CompilerParams(
            dimension_semantics=("parallel", "parallel"),
            vmem_limit_bytes=vmem_limit,
        ),
    )(x, mean_f, inv_std)
    return out


if __name__ == "__main__":
    key = jax.random.PRNGKey(0)
    kx, km, ks = jax.random.split(key, 3)

    # B=13 (not a multiple of 8) and F=32 (not lane-aligned) exercise the
    # masked ragged-boundary path with NO wrapper-side padding/slicing of x.
    B, F = 13, 32
    x = jax.random.normal(kx, (B, F), dtype=jnp.float32)
    mean = jax.random.normal(km, (F,), dtype=jnp.float32)
    std = jnp.abs(jax.random.normal(ks, (F,), dtype=jnp.float32))
    std = std.at[:4].set(0.0)  # exercise the std==0 -> 1.0 path

    safe_std = jnp.where(std == 0.0, 1.0, std)
    ref = (x - mean[None, :]) / safe_std[None, :]

    # f32 input, f32 output (matches PyTorch .float() semantics)
    out = jax.block_until_ready(base_module_forward(x, mean, std))
    assert out.shape == (B, F) and out.dtype == jnp.float32
    assert jnp.allclose(out, ref, atol=1e-5, rtol=1e-5), "mismatch vs reference (f32)"

    # bf16 input path: cast happens inside the kernel (no wrapper f32 copy)
    x_bf16 = x.astype(jnp.bfloat16)
    out_bf = jax.block_until_ready(base_module_forward(x_bf16, mean, std))
    ref_bf = (x_bf16.astype(jnp.float32) - mean[None, :]) / safe_std[None, :]
    assert jnp.allclose(out_bf, ref_bf, atol=1e-5, rtol=1e-5), "mismatch vs reference (bf16 in)"

    # opt-in bf16 output (halves write traffic for bf16 consumers)
    out_b16o = jax.block_until_ready(
        base_module_forward(x, mean, std, out_dtype=jnp.bfloat16))
    assert out_b16o.dtype == jnp.bfloat16
    assert jnp.allclose(out_b16o.astype(jnp.float32), ref, atol=2e-2, rtol=2e-2), \
        "mismatch vs reference (bf16 out)"

    # Force the feature-split path: ragged feature boundary + padded mean/inv_std.
    F2 = 300
    x2 = jax.random.normal(kx, (B, F2), dtype=jnp.float32)
    mean2 = jax.random.normal(km, (F2,), dtype=jnp.float32)
    std2 = jnp.abs(jax.random.normal(ks, (F2,), dtype=jnp.float32)) + 0.1
    out2 = jax.block_until_ready(
        base_module_forward(x2, mean2, std2, tile_override=(8, 128)))
    ref2 = (x2 - mean2[None, :]) / std2[None, :]
    assert jnp.allclose(out2, ref2, atol=1e-5, rtol=1e-5), "mismatch vs reference (F split)"

    print("KERNEL_OK")
</pallas_src>

<mosaic_0001>
module attributes {stable_mosaic.version = 11 : i64} {
  func.func @_normalize_kernel(%arg0: i32, %arg1: i32, %arg2: memref<8x32xf32, #tpu.memory_space<vmem>>, %arg3: memref<1x32xf32, #tpu.memory_space<vmem>>, %arg4: memref<1x32xf32, #tpu.memory_space<vmem>>, %arg5: memref<8x32xf32, #tpu.memory_space<vmem>>) attributes {dimension_semantics = [#tpu.dimension_semantics<parallel>, #tpu.dimension_semantics<parallel>], iteration_bounds = array<i64: 1, 2>, scalar_prefetch = 0 : i64, scratch_operands = 0 : i64, tpu.core_type = #tpu.core_type<tc>, window_params = [{transform_indices = @transform_0, window_bounds = array<i64: 8, 32>}, {transform_indices = @transform_1, window_bounds = array<i64: 1, 32>}, {transform_indices = @transform_2, window_bounds = array<i64: 1, 32>}, {transform_indices = @transform_3, window_bounds = array<i64: 8, 32>}]} {
    %c0 = arith.constant 0 : index
    %c0_0 = arith.constant 0 : index
    %0 = vector.load %arg2[%c0, %c0_0] : memref<8x32xf32, #tpu.memory_space<vmem>>, vector<8x32xf32>
    %c0_1 = arith.constant 0 : index
    %c0_2 = arith.constant 0 : index
    %1 = vector.load %arg3[%c0_1, %c0_2] : memref<1x32xf32, #tpu.memory_space<vmem>>, vector<1x32xf32>
    %2 = vector.broadcast %1 : vector<1x32xf32> to vector<8x32xf32>
    %3 = arith.subf %0, %2 : vector<8x32xf32>
    %c0_3 = arith.constant 0 : index
    %c0_4 = arith.constant 0 : index
    %4 = vector.load %arg4[%c0_3, %c0_4] : memref<1x32xf32, #tpu.memory_space<vmem>>, vector<1x32xf32>
    %5 = vector.broadcast %4 : vector<1x32xf32> to vector<8x32xf32>
    %6 = arith.mulf %3, %5 : vector<8x32xf32>
    %c0_5 = arith.constant 0 : index
    %c0_6 = arith.constant 0 : index
    %7 = vector.load %arg5[%c0_5, %c0_6] : memref<8x32xf32, #tpu.memory_space<vmem>>, vector<8x32xf32>
    tpu.vector_store %arg5[%c0_5, %c0_6], %6 {strides = array<i32>} : memref<8x32xf32, #tpu.memory_space<vmem>>, vector<8x32xf32>,
    return
  }
  func.func @transform_0(%arg0: i32, %arg1: i32) -> (i32, i32) {
    %c0_i32 = arith.constant 0 : i32
    return %arg1, %arg0 : i32, i32
  }
  func.func @transform_1(%arg0: i32, %arg1: i32) -> (i32, i32) {
    %c0_i32 = arith.constant 0 : i32
    %c0_i32_0 = arith.constant 0 : i32
    return %c0_i32, %arg0 : i32, i32
  }
  func.func @transform_2(%arg0: i32, %arg1: i32) -> (i32, i32) {
    %c0_i32 = arith.constant 0 : i32
    %c0_i32_0 = arith.constant 0 : i32
    return %c0_i32, %arg0 : i32, i32
  }
  func.func @transform_3(%arg0: i32, %arg1: i32) -> (i32, i32) {
    %c0_i32 = arith.constant 0 : i32
    return %arg1, %arg0 : i32, i32
  }
}

</mosaic_0001>

<bundles_post_ra>
// kernel: tpu_custom_call.1
= control target key start
LH: loop header
LB: loop body
LE: loop exit
PB: predicated region body
PF: predicated region fallthrough
CT: control target
= control target key end

     0   :  { %8 = vsyncpa [#allocation3], 0  ;;  %s785_s0 = inlined_call_operand.hbm [shape: f32[13,32], index: 0, kind: input, shape index: {}]   ;;  %s786_s1 = inlined_call_operand.hbm [shape: f32[1,32], index: 1, kind: input, shape index: {}]   ;;  %s787_s2 = inlined_call_operand.vmem [shape: f32[1,32], index: 2, kind: input, shape index: {}]   ;;  %s788_s3 = inlined_call_operand.hbm [shape: f32[13,32], index: 3, kind: output, shape index: {}]  }
   0x1   :  { %10 = vsyncpa [#allocation3 + $0x1], 0 }
   0x2   :  { %11 = vsyncpa [#allocation6], 0 }
   0x3   :  { %12 = vsyncpa [#allocation4], 0 }
   0x4   :  { %14 = vsyncpa [#allocation4 + $0x1], 0  ;;  %s633_s12 = smov 0   ;;  %s635_s13 = smov 0  }
   0x5   :  { %s637_s14 = smov 0   ;;  %s639_s15 = smov 0  }
   0x6   :  { %s641_s16 = smov 0   ;;  %s643_s17 = smov 0  }
   0x7 LB: > { %s373_s18 = sadd.s32 4294967295, %s610_s17   ;;  %s374_s19 = sadd.s32 4294967294, %s610_s17   ;;  %s610_s17 = sphi %s643_s17, %s20_s17   ;;  %s606_s16 = sphi %s641_s16, %s800_s16   ;;  %s602_s15 = sphi %s639_s15, %s799_s15   ;;  %s598_s14 = sphi %s637_s14, %s798_s14   ;;  %s594_s13 = sphi %s635_s13, %s797_s13   ;;  %s590_s12 = sphi %s633_s12, %s796_s12  }
   0x8   : > { %p54_p0 = scmp.ne.s32.totalorder %s594_s13, %s590_s12  ;;  %p667_p1 = scmp.eq.s32.totalorder %s373_s18, 0 }
   0x9   : > { %p671_p2 = scmp.eq.s32.totalorder %s373_s18, 1  ;;  %p138_p3 = scmp.eq.s32.totalorder %s374_s19, 1 }
   0xa   : > { %p677_p4 = por %p667_p1, %p54_p0  ;;  %p375_p5 = scmp.ge.s32.totalorder %s610_s17, 1 }
   0xb   : > { %p682_p6 = por %p138_p3, %p54_p0  ;;  %p145_p7 = scmp.lt.s32.totalorder %s610_s17, 3 }
   0xc   : > { %s158_s26 = sshll.u32 %s786_s1, 4  ;;  %p378_p9 = scmp.ge.s32.totalorder %s610_s17, 2  ;;  %s159_s26 = int_to_ptr.hbm [resolvable:$true] %s158_s26 }
   0xd   : > { %p690_p8 = pnand %p375_p5, %p145_p7  ;;  %s612_s28 = smov [#allocation5]  }
   0xe   : > { %s160_s29 = sshll.u32 %s612_s28, 4  ;;  %s29_s30 = sadd.s32 1, %s606_s16  ;;  %s161_s29 = int_to_ptr.vmem [resolvable:$true] %s160_s29 }
   0xf   : > { %p397_p10 = pneg %p690_p8  ;;  %p30_p12 = scmp.ge.s32.totalorder %s29_s30, 2 }
  0x10   : > { %s41_s4 = sadd.s32 1, %s598_s14  ;;  %p48_p13 = scmp.ne.s32.totalorder %s598_s14, %s594_s13 }
  0x11   : > { %p398_p11 = pnand %p397_p10, %p667_p1  ;;  %p49_p0 = scmp.eq.s32.totalorder %s610_s17, 0 }
  0x12   : > { %s802_s30 = smov (%p30_p12, %s29_s30), 0  ;;  %p712_p5 = por %p671_p2, %p48_p13 }
  0x13   : > { %400 = dma.hbm_to_vmem [thread:$0]  (!%p398_p11), %s159_s26, 16, %s161_s29, [#allocation6]  }
  0x14   : > { %p706_p3 = por %p49_p0, %p48_p13  ;;  %s36_s7 = ssub.s32 %s606_s16, %s802_s30 }
  0x15   : > { %p410_p7 = scmp.lt.s32.totalorder %s610_s17, 2  ;;  %p39_p10 = scmp.eq.s32.totalorder %s36_s7, 0 }
  0x16   : > { %s177_s8 = sand.u32 1, %s598_s14   ;;  %s380_s11 = sshll.u32 %s606_s16, 3 }
  0x17   : > { %s379_s9 = sshll.u32 %s177_s8, 3  ;;  %s186_s24 = scalar_lea.hbm %s785_s0, %s380_s11 }
  0x18   : > { %s721_s10 = scalar_select %p39_p10, %s598_s14, %s41_s4  }
  0x19   : > { %s181_s25 = scalar_lea.vmem [#allocation2], %s379_s9  ;;  %s188_s21 = sshll.u32 %s186_s24, 4  ;;  %s189_s21 = int_to_ptr.hbm [resolvable:$true] %s188_s21 }
  0x1a   : > { %s190_s26 = sshll.u32 %s181_s25, 4  ;;  %p402_p2 = pnand %p410_p7, %p706_p3  ;;  %s191_s26 = int_to_ptr.vmem [resolvable:$true] %s190_s26 }
  0x1b   : > { %s178_s28 = scalar_lea.sflag [#allocation3], %s177_s8  ;;  %199 = sbr.rel (%p690_p8) target bundleno = 50 (0x32), region = 32 }
  0x1c   : > { %404 = dma.hbm_to_vmem [thread:$0]  (!%p402_p2), %s189_s21, 128, %s191_s26, %s178_s28  }
  0x1d   : > { %s732_s29 = sand.u32 (!%p690_p8), 1, %s594_s13  }
  0x1e   : > { %s382_s4 = sshll.u32 (!%p690_p8), %s732_s29, 3  ;;  %s202_s7 = scalar_lea.sflag (!%p690_p8), [#allocation3], %s732_s29 }
  0x1f   : > { %s205_s9 = scalar_lea.vmem (!%p690_p8), [#allocation2], %s382_s4 }
  0x20   : > { %577 = dma.done.wait (%p677_p4), %s202_s7, 128  }
  0x21   : > { %579 = vsyncadd (%p677_p4), %s202_s7, 4294967168 }
  0x22   : > { %581 = dma.done.wait (%p667_p1), [#allocation6], 16  }
  0x23   : > { %583 = vsyncadd (%p667_p1), [#allocation6], 4294967280  ;;  %s386_s27 = sshll.u32 %s602_s15, 3  ;;  %v240_v0 = vld [vmem:[%s205_s9] sm:$0xff]  ;;  %v462_v1 = vld [vmem:[#allocation5] ss:$0 sm:$0xff] }
  0x24   : > { %s265_s11 = scalar_lea.hbm %s788_s3, %s386_s27  ;;  %v463_v2 = vld [vmem:[%s787_s2] ss:$0 sm:$0xff]  ;;  %s236_s22 = scalar_lea.vmem [#allocation7], %s382_s4  ;;  %v245_v3 = vsub.f32 %v240_v0, %v462_v1  ;;  %vm251_vm0 = vcmask 261120  }
  0x25   : > { %s267_s24 = sshll.u32 %s236_s22, 4  ;;  %s269_s25 = sshll.u32 %s265_s11, 4  ;;  %s268_s24 = int_to_ptr.vmem [resolvable:$true] %s267_s24  ;;  %s270_s25 = int_to_ptr.hbm [resolvable:$true] %s269_s25 }
  0x26   : > { %v250_v4 = vmul.f32 %v463_v2, %v245_v3  ;;  %s254_s15 = scalar_lea.sflag [#allocation4], %s732_s29  ;;  %s538_s20 = sshra.s32 %s270_s25, 4  ;;  %s539_s20 = int_to_ptr.hbm [resolvable:$true] %s538_s20 }
  0x27   : > { %s540_s26 = scalar_lea.hbm %s539_s20, 8  ;;  %s544_s4 = scalar_lea.hbm %s788_s3, 16 }
  0x28   : > { %252 = vst.msk [vmem:[%s236_s22] sm:$0xff] %vm251_vm0, %v250_v4  ;;  %p541_p1 = scmp.ne.s32.totalorder %s539_s20, %s540_s26  ;;  %p545_p11 = scmp.lt.s32.totalorder %s539_s20, %s788_s3 }
  0x29   : > { %p546_p12 = scmp.lt.s32.totalorder %s544_s4, %s540_s26 }
  0x2a   : > { %p542_p4 = pnand %p541_p1, %p712_p5 }
  0x2b   : > { %p547_p13 = por %p546_p12, %p545_p11 }
  0x2c   : > { %p543_p8 = pneg %p542_p4 }
  0x2e   : > { %p548_p0 = pnand %p547_p13, %p543_p8 }
  0x30   : > { %551 = shalt.err (!%p548_p0)
}
  0x31   : > { %395 = dma.vmem_to_hbm [thread:$0]  (%p712_p5), %s268_s24, 128, %s270_s25, %s254_s15  }
  0x32 PF: > { %s281_s29 = sand.u32 1, %s590_s12   ;;  %p406_p3 = pnand %p378_p9, %p682_p6 }
  0x33   : > { %s282_s27 = scalar_lea.sflag [#allocation4], %s281_s29 }
  0x34   : > { %p407_p7 = pneg %p406_p3 }
  0x36   : > { %585 = dma.done.wait (%p407_p7), %s282_s27, 128  }
  0x37   : > { %587 = vsyncadd (%p407_p7), %s282_s27, 4294967168  ;;  %s20_s17 = sadd.s32 1, %s610_s17   ;;  %s796_s12 = smov %s594_s13 }
  0x38   : > { %p17_p10 = scmp.ge.s32.totalorder %s20_s17, 4   ;;  %s797_s13 = smov %s598_s14 }
  0x39   : > { %s798_s14 = smov %s721_s10  ;;  %s799_s15 = smov %s606_s16 }
  0x3a   : > { %s800_s16 = smov %s802_s30  ;;  %19 = sbr.rel (!%p17_p10) target bundleno = 7 (0x7), region = 85 }
  0x3f   :  { %288 = vsyncpa [#allocation3], 1 }
  0x40   :  { %290 = vsyncpa [#allocation3 + $0x1], 1 }
  0x41   :  { %291 = vsyncpa [#allocation6], 1 }
  0x42   :  { %292 = vsyncpa [#allocation4], 1 }
  0x43   :  { %294 = vsyncpa [#allocation4 + $0x1], 1 }

</bundles_post_ra>
